<compile_context>
chip_gen: v7x
topology: tpu7x:2x2x1
jax: 0.10.0
libtpu: 0.0.40
codegen_flags: <defaults>
</compile_context>

<pallas_src>
import functools

import jax
import jax.numpy as jnp
from jax.experimental import pallas as pl
from jax.experimental.pallas import tpu as pltpu


def _round_up(a: int, b: int) -> int:
    return (a + b - 1) // b * b


def ffn_kernel(x_ref, w1_ref, b1_ref, w2_ref, b2_ref, o_ref):
    # x_ref: (tm, C) bf16, w1_ref: (C, H) bf16, b1_ref: (1, H) f32,
    # w2_ref: (H, C) bf16, b2_ref: (1, C) f32, o_ref: (tm, C) out dtype.
    x = x_ref[...]
    # Expansion (bf16 x bf16 -> f32 accumulate) + bias + ReLU.
    h = jnp.dot(x, w1_ref[...], preferred_element_type=jnp.float32) + b1_ref[...]
    # Keep the (tm, H) intermediate in bf16: halves vreg/VMEM footprint of the
    # largest temporary and feeds the MXU at full rate.
    h = jnp.maximum(h, 0.0).astype(jnp.bfloat16)
    # Contraction (bf16 x bf16 -> f32 accumulate) + bias.
    y = jnp.dot(h, w2_ref[...], preferred_element_type=jnp.float32) + b2_ref[...]
    o_ref[...] = y.astype(o_ref.dtype)


@functools.partial(jax.jit, static_argnames=("tm",))
def feed_forward_network(x, w1, b1, w2, b2, *, tm=256):
    """x: (..., C);  w1: (C, H);  b1: (H,);  w2: (H, C);  b2: (C,)."""
    orig_shape = x.shape
    out_dtype = x.dtype
    C = orig_shape[-1]
    H = w1.shape[1]

    x2d = x.reshape(-1, C)
    M = x2d.shape[0]

    # bf16 matmul operands; biases stay f32 (added into the f32 accumulator).
    x2d = x2d.astype(jnp.bfloat16)
    w1_b = w1.astype(jnp.bfloat16)
    w2_b = w2.astype(jnp.bfloat16)
    b1_2d = b1.astype(jnp.float32).reshape(1, H)
    b2_2d = b2.astype(jnp.float32).reshape(1, C)

    # Row tile: bf16 packs 2 rows / sublane -> align to 16. Clamp the tile to the
    # (aligned) row count for small inputs so tiny problems don't pad to 256 rows.
    row_align = 16
    tm_eff = _round_up(min(tm, _round_up(M, row_align)), row_align)
    M_pad = _round_up(M, tm_eff)
    if M_pad != M:
        x2d = jnp.pad(x2d, ((0, M_pad - M), (0, 0)))

    grid = (M_pad // tm_eff,)

    out = pl.pallas_call(
        ffn_kernel,
        out_shape=jax.ShapeDtypeStruct((M_pad, C), out_dtype),
        grid_spec=pltpu.PrefetchScalarGridSpec(
            num_scalar_prefetch=0,
            grid=grid,
            in_specs=[
                # x tile: streamed (double-buffered by default).
                pl.BlockSpec((tm_eff, C), lambda i: (i, 0)),
                # Weights / biases are grid-invariant: single-buffer them.
                pl.BlockSpec((C, H), lambda i: (0, 0),
                             pipeline_mode=pl.Buffered(1)),
                pl.BlockSpec((1, H), lambda i: (0, 0),
                             pipeline_mode=pl.Buffered(1)),
                pl.BlockSpec((H, C), lambda i: (0, 0),
                             pipeline_mode=pl.Buffered(1)),
                pl.BlockSpec((1, C), lambda i: (0, 0),
                             pipeline_mode=pl.Buffered(1)),
            ],
            out_specs=pl.BlockSpec((tm_eff, C), lambda i: (i, 0)),
        ),
        compiler_params=pltpu.CompilerParams(
            dimension_semantics=("parallel",),
            vmem_limit_bytes=64 * 1024 * 1024,
        ),
    )(x2d, w1_b, b1_2d, w2_b, b2_2d)

    if M_pad != M:
        out = out[:M]

    # Dropout: identity in eval mode (training=False, enable_sampling=False).
    return out.reshape(orig_shape)


def init_params(key, in_channels, hidden_channels, dtype=jnp.float32):
    """Deterministic init mimicking nn.Linear's U(-1/sqrt(fan_in), 1/sqrt(fan_in))."""
    k1, k2, k3, k4 = jax.random.split(key, 4)
    lim1 = 1.0 / (in_channels ** 0.5)
    lim2 = 1.0 / (hidden_channels ** 0.5)
    # Stored pre-transposed: (in, out) so the kernel does x @ W.
    w1 = jax.random.uniform(k1, (in_channels, hidden_channels), dtype, -lim1, lim1)
    b1 = jax.random.uniform(k2, (hidden_channels,), dtype, -lim1, lim1)
    w2 = jax.random.uniform(k3, (hidden_channels, in_channels), dtype, -lim2, lim2)
    b2 = jax.random.uniform(k4, (in_channels,), dtype, -lim2, lim2)
    return w1, b1, w2, b2


def _reference(x, w1, b1, w2, b2):
    # Eval-mode reference (dropout = identity), full f32.
    return jnp.maximum(x @ w1 + b1, 0.0) @ w2 + b2


if __name__ == "__main__":
    batch, seq = 2, 8
    in_channels, hidden_channels = 128, 256

    key = jax.random.PRNGKey(0)
    kx, kp, kx2 = jax.random.split(key, 3)
    x = jax.random.normal(kx, (batch, seq, in_channels), jnp.float32)
    w1, b1, w2, b2 = init_params(kp, in_channels, hidden_channels)

    out = feed_forward_network(x, w1, b1, w2, b2)
    out = jax.block_until_ready(out)

    ref = _reference(x, w1, b1, w2, b2)
    assert out.shape == x.shape
    assert out.dtype == x.dtype
    # bf16 matmul inputs with f32 accumulation -> compare at bf16-level tolerance.
    assert jnp.allclose(out, ref, atol=2e-2, rtol=2e-2)

    # Second case: row count NOT a multiple of the sublane alignment -> exercises
    # the pad-and-slice path (no divisibility assert anymore).
    x2 = jax.random.normal(kx2, (3, 5, in_channels), jnp.float32)
    out2 = jax.block_until_ready(feed_forward_network(x2, w1, b1, w2, b2))
    ref2 = _reference(x2, w1, b1, w2, b2)
    assert out2.shape == x2.shape
    assert jnp.allclose(out2, ref2, atol=2e-2, rtol=2e-2)

    print("KERNEL_OK")
</pallas_src>

<mosaic_0001>
module attributes {stable_mosaic.version = 11 : i64} {
  func.func @ffn_kernel(%arg0: i32, %arg1: memref<16x128xbf16, #tpu.memory_space<vmem>>, %arg2: memref<128x256xbf16, #tpu.memory_space<vmem>>, %arg3: memref<1x256xf32, #tpu.memory_space<vmem>>, %arg4: memref<256x128xbf16, #tpu.memory_space<vmem>>, %arg5: memref<1x128xf32, #tpu.memory_space<vmem>>, %arg6: memref<16x128xf32, #tpu.memory_space<vmem>>) attributes {dimension_semantics = [#tpu.dimension_semantics<parallel>], iteration_bounds = array<i64: 1>, scalar_prefetch = 0 : i64, scratch_operands = 0 : i64, tpu.core_type = #tpu.core_type<tc>, window_params = [{transform_indices = @transform_0, window_bounds = array<i64: 16, 128>}, {pipeline_mode = #tpu.pipeline_mode<synchronous>, transform_indices = @transform_1, window_bounds = array<i64: 128, 256>}, {pipeline_mode = #tpu.pipeline_mode<synchronous>, transform_indices = @transform_2, window_bounds = array<i64: 1, 256>}, {pipeline_mode = #tpu.pipeline_mode<synchronous>, transform_indices = @transform_3, window_bounds = array<i64: 256, 128>}, {pipeline_mode = #tpu.pipeline_mode<synchronous>, transform_indices = @transform_4, window_bounds = array<i64: 1, 128>}, {transform_indices = @transform_5, window_bounds = array<i64: 16, 128>}]} {
    %c0 = arith.constant 0 : index
    %c0_0 = arith.constant 0 : index
    %0 = vector.load %arg1[%c0, %c0_0] : memref<16x128xbf16, #tpu.memory_space<vmem>>, vector<16x128xbf16>
    %c0_1 = arith.constant 0 : index
    %c0_2 = arith.constant 0 : index
    %1 = vector.load %arg2[%c0_1, %c0_2] : memref<128x256xbf16, #tpu.memory_space<vmem>>, vector<128x256xbf16>
    %cst = arith.constant dense<0.000000e+00> : vector<16x256xf32>
    %2 = tpu.matmul %0, %1, %cst {dimension_numbers = #tpu.dot_dimension_numbers<[1], [0], [0], [1], [0, 0, 1, 1], [], []>} : vector<16x128xbf16>, vector<128x256xbf16>, vector<16x256xf32> -> vector<16x256xf32>
    %c0_3 = arith.constant 0 : index
    %c0_4 = arith.constant 0 : index
    %3 = vector.load %arg3[%c0_3, %c0_4] : memref<1x256xf32, #tpu.memory_space<vmem>>, vector<1x256xf32>
    %4 = vector.broadcast %3 : vector<1x256xf32> to vector<16x256xf32>
    %5 = arith.addf %2, %4 : vector<16x256xf32>
    %cst_5 = arith.constant 0.000000e+00 : f32
    %6 = vector.broadcast %cst_5 : f32 to vector<16x256xf32>
    %7 = arith.maximumf %5, %6 : vector<16x256xf32>
    %8 = arith.truncf %7 : vector<16x256xf32> to vector<16x256xbf16>
    %c0_6 = arith.constant 0 : index
    %c0_7 = arith.constant 0 : index
    %9 = vector.load %arg4[%c0_6, %c0_7] : memref<256x128xbf16, #tpu.memory_space<vmem>>, vector<256x128xbf16>
    %cst_8 = arith.constant dense<0.000000e+00> : vector<16x128xf32>
    %10 = tpu.matmul %8, %9, %cst_8 {dimension_numbers = #tpu.dot_dimension_numbers<[1], [0], [0], [1], [0, 0, 1, 1], [], []>} : vector<16x256xbf16>, vector<256x128xbf16>, vector<16x128xf32> -> vector<16x128xf32>
    %c0_9 = arith.constant 0 : index
    %c0_10 = arith.constant 0 : index
    %11 = vector.load %arg5[%c0_9, %c0_10] : memref<1x128xf32, #tpu.memory_space<vmem>>, vector<1x128xf32>
    %12 = vector.broadcast %11 : vector<1x128xf32> to vector<16x128xf32>
    %13 = arith.addf %10, %12 : vector<16x128xf32>
    %c0_11 = arith.constant 0 : index
    %c0_12 = arith.constant 0 : index
    %14 = vector.load %arg6[%c0_11, %c0_12] : memref<16x128xf32, #tpu.memory_space<vmem>>, vector<16x128xf32>
    tpu.vector_store %arg6[%c0_11, %c0_12], %13 {strides = array<i32>} : memref<16x128xf32, #tpu.memory_space<vmem>>, vector<16x128xf32>,
    return
  }
  func.func @transform_0(%arg0: i32) -> (i32, i32) {
    %c0_i32 = arith.constant 0 : i32
    %c0_i32_0 = arith.constant 0 : i32
    return %arg0, %c0_i32 : i32, i32
  }
  func.func @transform_1(%arg0: i32) -> (i32, i32) {
    %c0_i32 = arith.constant 0 : i32
    %c0_i32_0 = arith.constant 0 : i32
    %c0_i32_1 = arith.constant 0 : i32
    return %c0_i32, %c0_i32_0 : i32, i32
  }
  func.func @transform_2(%arg0: i32) -> (i32, i32) {
    %c0_i32 = arith.constant 0 : i32
    %c0_i32_0 = arith.constant 0 : i32
    %c0_i32_1 = arith.constant 0 : i32
    return %c0_i32, %c0_i32_0 : i32, i32
  }
  func.func @transform_3(%arg0: i32) -> (i32, i32) {
    %c0_i32 = arith.constant 0 : i32
    %c0_i32_0 = arith.constant 0 : i32
    %c0_i32_1 = arith.constant 0 : i32
    return %c0_i32, %c0_i32_0 : i32, i32
  }
  func.func @transform_4(%arg0: i32) -> (i32, i32) {
    %c0_i32 = arith.constant 0 : i32
    %c0_i32_0 = arith.constant 0 : i32
    %c0_i32_1 = arith.constant 0 : i32
    return %c0_i32, %c0_i32_0 : i32, i32
  }
  func.func @transform_5(%arg0: i32) -> (i32, i32) {
    %c0_i32 = arith.constant 0 : i32
    %c0_i32_0 = arith.constant 0 : i32
    return %arg0, %c0_i32 : i32, i32
  }
}

</mosaic_0001>

<bundles_post_ra>
// kernel: feed_forward_network.1
= control target key start
LH: loop header
LB: loop body
LE: loop exit
PB: predicated region body
PF: predicated region fallthrough
CT: control target
= control target key end

     0   :  { %10 = vsyncpa [#allocation3], 0  ;;  %s815_s0 = inlined_call_operand.hbm [shape: bf16[16,128], index: 0, kind: input, shape index: {}]   ;;  %s816_s1 = inlined_call_operand.hbm [shape: bf16[128,256], index: 1, kind: input, shape index: {}]   ;;  %s817_s2 = inlined_call_operand.hbm [shape: f32[1,256], index: 2, kind: input, shape index: {}]   ;;  %s818_s3 = inlined_call_operand.hbm [shape: bf16[256,128], index: 3, kind: input, shape index: {}]   ;;  %s819_s4 = inlined_call_operand.hbm [shape: f32[1,128], index: 4, kind: input, shape index: {}]   ;;  %s820_s5 = inlined_call_operand.hbm [shape: f32[16,128], index: 5, kind: output, shape index: {}]  }
   0x1   :  { %11 = vsyncpa [#allocation6], 0 }
   0x2   :  { %12 = vsyncpa [#allocation9], 0 }
   0x3   :  { %13 = vsyncpa [#allocation4], 0  ;;  %s696_s18 = smov [#allocation5]   ;;  %s556_s22 = scalar_lea.hbm %s816_s1, 2048 }
   0x4   :  { %s31_s19 = sshll.u32 %s696_s18, 4  ;;  %p557_p0 = scmp.ne.s32.totalorder %s816_s1, %s556_s22  ;;  %s32_s19 = int_to_ptr.vmem [resolvable:$true] %s31_s19 }
   0x5   :  { %p560_p1 = scmp.lt.u32.totalorder %s556_s22, %s816_s1 }
   0x7   :  { %p562_p2 = pnand %p560_p1, %p557_p0 }
   0x9   :  { %565 = shalt.err (!%p562_p2)
}
   0xa   :  { %s566_s27 = scalar_lea.vmem %s32_s19, 2048  ;;  %p571_p4 = scmp.lt.s32.totalorder %s32_s19, %s32_s19 }
   0xb   :  { %p567_p3 = scmp.ne.s32.totalorder %s32_s19, %s566_s27  ;;  %p572_p5 = scmp.lt.s32.totalorder %s566_s27, %s566_s27 }
   0xd   :  { %p573_p6 = por %p572_p5, %p571_p4 }
   0xf   :  { %p574_p7 = pnand %p573_p6, %p567_p3 }
  0x11   :  { %577 = shalt.err (!%p574_p7)
}
  0x12   :  { %s697_s28 = smov 128   ;;  %s698_s29 = smov 8  }
  0x13   :  { %37 = dma.hbm_to_vmem [thread:$0]  %s816_s1, 2048, %s32_s19, [#allocation6], %s697_s28, %s697_s28, %s698_s29  }
  0x14   :  { %s699_s7 = smov [#allocation8]   ;;  %s700_s9 = smov [#allocation2]  }
  0x15   :  { %s53_s8 = sshll.u32 %s699_s7, 4  ;;  %s19_s10 = sshll.u32 %s700_s9, 4  ;;  %s54_s8 = int_to_ptr.vmem [resolvable:$true] %s53_s8  ;;  %s20_s10 = int_to_ptr.vmem [resolvable:$true] %s19_s10 }
  0x16   :  { %s578_s13 = scalar_lea.hbm %s818_s3, 2048 }
  0x17   :  { %p579_p8 = scmp.ne.s32.totalorder %s818_s3, %s578_s13  ;;  %p582_p9 = scmp.lt.u32.totalorder %s578_s13, %s818_s3 }
  0x19   :  { %p584_p10 = pnand %p582_p9, %p579_p8 }
  0x1b   :  { %587 = shalt.err (!%p584_p10)
}
  0x1c   :  { %s588_s1 = scalar_lea.vmem %s54_s8, 2048  ;;  %p593_p12 = scmp.lt.s32.totalorder %s54_s8, %s54_s8 }
  0x1d   :  { %p589_p11 = scmp.ne.s32.totalorder %s54_s8, %s588_s1  ;;  %p594_p13 = scmp.lt.s32.totalorder %s588_s1, %s588_s1 }
  0x1f   :  { %p595_p0 = por %p594_p13, %p593_p12 }
  0x21   :  { %p596_p1 = pnand %p595_p0, %p589_p11 }
  0x23   :  { %599 = shalt.err (!%p596_p1)
}
  0x24   :  { %s701_s18 = smov 64   ;;  %s702_s19 = smov 4  }
  0x25   :  { %59 = dma.hbm_to_vmem [thread:$0]  %s818_s3, 2048, %s54_s8, [#allocation9], %s701_s18, %s701_s18, %s702_s19  }
  0x26   :  { %s600_s24 = scalar_lea.hbm %s815_s0, 128 }
  0x27   :  { %p601_p2 = scmp.ne.s32.totalorder %s815_s0, %s600_s24  ;;  %p604_p3 = scmp.lt.u32.totalorder %s600_s24, %s815_s0 }
  0x29   :  { %p606_p4 = pnand %p604_p3, %p601_p2 }
  0x2b   :  { %609 = shalt.err (!%p606_p4)
}
  0x2c   :  { %s610_s6 = scalar_lea.vmem %s20_s10, 128  ;;  %p615_p6 = scmp.lt.s32.totalorder %s20_s10, %s20_s10 }
  0x2d   :  { %p611_p5 = scmp.ne.s32.totalorder %s20_s10, %s610_s6  ;;  %p616_p7 = scmp.lt.s32.totalorder %s610_s6, %s610_s6 }
  0x2f   :  { %p617_p8 = por %p616_p7, %p615_p6 }
  0x31   :  { %p618_p9 = pnand %p617_p8, %p611_p5 }
  0x33   :  { %621 = shalt.err (!%p618_p9)
}
  0x34   :  { %25 = dma.hbm_to_vmem [thread:$0]  %s815_s0, 128, %s20_s10, [#allocation3], %s701_s18, %s701_s18, %s702_s19  }
  0x35   :  { %s703_s8 = smov [#allocation7]   ;;  %s704_s11 = smov [#allocation10]  }
  0x36   :  { %s44_s9 = sshll.u32 %s703_s8, 4  ;;  %s66_s12 = sshll.u32 %s704_s11, 4  ;;  %s45_s9 = int_to_ptr.vmem [resolvable:$true] %s44_s9  ;;  %s67_s12 = int_to_ptr.vmem [resolvable:$true] %s66_s12 }
  0x37   :  { %s622_s15 = scalar_lea.hbm %s817_s2, 32 }
  0x38   :  { %p623_p10 = scmp.ne.s32.totalorder %s817_s2, %s622_s15  ;;  %p626_p11 = scmp.lt.u32.totalorder %s622_s15, %s817_s2 }
  0x3a   :  { %p628_p12 = pnand %p626_p11, %p623_p10 }
  0x3c   :  { %631 = shalt.err (!%p628_p12)
}
  0x3d   :  { %s632_s0 = scalar_lea.vmem %s45_s9, 32  ;;  %p637_p0 = scmp.lt.s32.totalorder %s45_s9, %s45_s9 }
  0x3e   :  { %p633_p13 = scmp.ne.s32.totalorder %s45_s9, %s632_s0  ;;  %p638_p1 = scmp.lt.s32.totalorder %s632_s0, %s632_s0 }
  0x40   :  { %p639_p2 = por %p638_p1, %p637_p0 }
  0x42   :  { %p640_p3 = pnand %p639_p2, %p633_p13 }
  0x44   :  { %643 = shalt.err (!%p640_p3)
}
  0x45   :  { %47 = dma.hbm_to_vmem [thread:$0]  %s817_s2, 32, %s45_s9, [#allocation6]  }
  0x46   :  { %s644_s22 = scalar_lea.hbm %s819_s4, 16 }
  0x47   :  { %p645_p4 = scmp.ne.s32.totalorder %s819_s4, %s644_s22  ;;  %p648_p5 = scmp.lt.u32.totalorder %s644_s22, %s819_s4 }
  0x49   :  { %p650_p6 = pnand %p648_p5, %p645_p4 }
  0x4b   :  { %653 = shalt.err (!%p650_p6)
}
  0x4c   :  { %s654_s27 = scalar_lea.vmem %s67_s12, 16  ;;  %s658_s30 = scalar_lea.vmem %s67_s12, 32 }
  0x4d   :  { %p655_p7 = scmp.ne.s32.totalorder %s67_s12, %s654_s27  ;;  %p659_p8 = scmp.lt.s32.totalorder %s67_s12, %s67_s12 }
  0x4e   :  { %p660_p9 = scmp.lt.s32.totalorder %s658_s30, %s654_s27 }
  0x50   :  { %p661_p10 = por %p660_p9, %p659_p8 }
  0x52   :  { %p662_p11 = pnand %p661_p10, %p655_p7 }
  0x54   :  { %665 = shalt.err (!%p662_p11)
}
  0x55   :  { %69 = dma.hbm_to_vmem [thread:$0]  %s819_s4, 16, %s67_s12, [#allocation9]  }
  0x56   :  { %688 = dma.done.wait [#allocation3], 128  }
  0x57   :  { %689 = vsyncadd [#allocation3], 4294967168 }
  0x58   :  { %690 = dma.done.wait [#allocation6], 2080  }
  0x59   :  { %691 = vsyncadd [#allocation6], 4294965216 }
  0x5a   :  { %692 = dma.done.wait [#allocation9], 2064  }
  0x5b   :  { %693 = vsyncadd [#allocation9], 4294965232  ;;  %v705_v0 = vmov 0   ;;  %v515_v1 = vld [vmem:[#allocation5 + $0x4] ss:$8 sps:$4 sm:$0xff]   ;;  %v544_v16 = vld [vmem:[#allocation8 + $0x50] sm:$0xff]   ;;  %v106_v34 = vlaneseq }
  0x5c   :  { %234 = vmatprep.mubr.bf16.mxu0 %v705_v0  ;;  %v517_v2 = vld [vmem:[#allocation5] ss:$8 sps:$4 sm:$0xff]   ;;  %202 = vmatprep.subr.bf16.mxu0 %v515_v1  ;;  %v518_v3 = vld [vmem:[#allocation5 + $0x14] ss:$8 sps:$4 sm:$0xff]   ;;  %v520_v4 = vld [vmem:[#allocation5 + $0x10] ss:$8 sps:$4 sm:$0xff]  }
  0x5d   :  { %203 = vmatpush1.bf16.msra.mxu0 %v517_v2  ;;  %v521_v5 = vld [vmem:[#allocation5 + $0x24] ss:$8 sps:$4 sm:$0xff]   ;;  %v523_v6 = vld [vmem:[#allocation5 + $0x20] ss:$8 sps:$4 sm:$0xff]   ;;  %v524_v7 = vld [vmem:[#allocation5 + $0x34] ss:$8 sps:$4 sm:$0xff]  }
  0x5e   :  { %204 = vmatprep.subr.bf16.mxu0 %v518_v3  ;;  %v526_v8 = vld [vmem:[#allocation5 + $0x30] ss:$8 sps:$4 sm:$0xff]   ;;  %v527_v9 = vld [vmem:[#allocation5 + $0x44] ss:$8 sps:$4 sm:$0xff]   ;;  %v529_v11 = vld [vmem:[#allocation5 + $0x40] ss:$8 sps:$4 sm:$0xff]  }
  0x5f   :  { %v540_v10 = vld [vmem:[#allocation8 + $0x40] sm:$0xff]   ;;  %v530_v13 = vld [vmem:[#allocation5 + $0x54] ss:$8 sps:$4 sm:$0xff]   ;;  %v542_v14 = vld [vmem:[#allocation8 + $0x48] sm:$0xff]   ;;  %v107_v35 = vshrl.u32 %v106_v34, 7  ;;  %s706_s4 = smov [#allocation11]  }
  0x60   :  { %v541_v12 = vld [vmem:[#allocation8] sm:$0xff]   ;;  %482 = vmatprep.subr.bf16.mxu1 %v540_v10  ;;  %v543_v15 = vld [vmem:[#allocation8 + $0x8] sm:$0xff]   ;;  %v545_v19 = vld [vmem:[#allocation8 + $0x10] sm:$0xff]   ;;  %s434_s3 = sshll.u32 %s706_s4, 4  ;;  %s435_s3 = int_to_ptr.vmem [resolvable:$true] %s434_s3 }
  0x61   :  { %205 = vmatpush1.bf16.msra.mxu0 %v520_v4  ;;  %483 = vmatpush3.bf16.msra.mxu1 %v541_v12  ;;  %v532_v17 = vld [vmem:[#allocation5 + $0x50] ss:$8 sps:$4 sm:$0xff]   ;;  %v533_v18 = vld [vmem:[#allocation5 + $0x64] ss:$8 sps:$4 sm:$0xff]   ;;  %v535_v21 = vld [vmem:[#allocation5 + $0x60] ss:$8 sps:$4 sm:$0xff]   ;;  %p671_p13 = scmp.lt.s32.totalorder %s435_s3, %s435_s3 }
  0x62   :  { %206 = vmatprep.subr.bf16.mxu0 %v521_v5  ;;  %484 = vmatprep.subr.bf16.mxu1 %v542_v14  ;;  %v546_v20 = vld [vmem:[#allocation8 + $0x58] sm:$0xff]   ;;  %v548_v24 = vld [vmem:[#allocation8 + $0x60] sm:$0xff]   ;;  %v550_v27 = vld [vmem:[#allocation8 + $0x68] sm:$0xff]   ;;  %v108_v36 = vsub.s32 0, %v107_v35  ;;  %v112_v38 = vsub.s32 1, %v107_v35  ;;  %s666_s7 = scalar_lea.vmem %s435_s3, 256 }
  0x63   :  { %v536_v22 = vld [vmem:[#allocation5 + $0x74] ss:$8 sps:$4 sm:$0xff]   ;;  %v538_v25 = vld [vmem:[#allocation5 + $0x70] ss:$8 sps:$4 sm:$0xff]   ;;  %v549_v26 = vld [vmem:[#allocation8 + $0x20] sm:$0xff]   ;;  %p667_p12 = scmp.ne.s32.totalorder %s435_s3, %s666_s7  ;;  %p672_p0 = scmp.lt.s32.totalorder %s666_s7, %s666_s7 }
  0x64   :  { %v547_v23 = vld [vmem:[#allocation8 + $0x18] sm:$0xff]   ;;  %v551_v29 = vld [vmem:[#allocation8 + $0x28] sm:$0xff]   ;;  %v552_v30 = vld [vmem:[#allocation8 + $0x70] sm:$0xff]  }
  0x65   :  { %207 = vmatpush1.bf16.msra.mxu0 %v523_v6  ;;  %485 = vmatpush3.bf16.msra.mxu1 %v543_v15  ;;  %v539_v28 = vld [vmem:[#allocation2] sm:$0xff]   ;;  %v104_v37 = vld [vmem:[#allocation7] sm:$0x3]  ;;  %v465_v56 = vld [vmem:[#allocation10] ss:$0 sm:$0xff]  ;;  %p673_p1 = por %p672_p0, %p671_p13 }
  0x66   :  { %208 = vmatprep.subr.bf16.mxu0 %v524_v7  ;;  %486 = vmatprep.subr.bf16.mxu1 %v544_v16  ;;  %v553_v31 = vld [vmem:[#allocation8 + $0x30] sm:$0xff]   ;;  %v554_v32 = vld [vmem:[#allocation8 + $0x78] sm:$0xff]   ;;  %v109_v39 = vrot.slane %v104_v37, %v108_v36  ;;  %v113_v40 = vrot.slane %v104_v37, %v112_v38 }
  0x67   :  { %v555_v33 = vld [vmem:[#allocation8 + $0x38] sm:$0xff]   ;;  %p674_p2 = pnand %p673_p1, %p667_p12 }
  0x69   :  { %209 = vmatpush1.bf16.msra.mxu0 %v526_v8  ;;  %487 = vmatpush3.bf16.msra.mxu1 %v545_v19 }
  0x6a   :  { %210 = vmatprep.subr.bf16.mxu0 %v527_v9  ;;  %488 = vmatprep.subr.bf16.mxu1 %v546_v20 }
  0x6d   :  { %211 = vmatpush1.bf16.msra.mxu0 %v529_v11  ;;  %489 = vmatpush3.bf16.msra.mxu1 %v547_v23 }
  0x6e   :  { %212 = vmatprep.subr.bf16.mxu0 %v530_v13  ;;  %490 = vmatprep.subr.bf16.mxu1 %v548_v24 }
  0x71   :  { %213 = vmatpush1.bf16.msra.mxu0 %v532_v17  ;;  %491 = vmatpush3.bf16.msra.mxu1 %v549_v26 }
  0x72   :  { %214 = vmatprep.subr.bf16.mxu0 %v533_v18  ;;  %492 = vmatprep.subr.bf16.mxu1 %v550_v27 }
  0x75   :  { %215 = vmatpush1.bf16.msra.mxu0 %v535_v21  ;;  %493 = vmatpush3.bf16.msra.mxu1 %v551_v29 }
  0x76   :  { %216 = vmatprep.subr.bf16.mxu0 %v536_v22  ;;  %494 = vmatprep.subr.bf16.mxu1 %v552_v30 }
  0x79   :  { %217 = vmatpush1.bf16.msra.mxu0 %v538_v25  ;;  %495 = vmatpush3.bf16.msra.mxu1 %v553_v31 }
  0x7a   :  { %496 = vmatprep.subr.bf16.mxu1 %v554_v32 }
  0x7c   :  { %235 = vmatmul.mubr.bf16.vlgmr.msra.gmra.mrb[0].mxu0 %v539_v28 }
  0x7d   :  { %497 = vmatpush3.bf16.msra.mxu1 %v555_v33 }
 0x14f   :  { %v236_v41 = vpop.f32.mrb[0].mxu0 }
 0x150   :  { %v237_v42 = vadd.f32 %v236_v41, %v109_v39  ;;  %v238_v43 = vpop.f32.mrb[1].mxu0 }
 0x151   :  { %v239_v44 = vadd.f32 %v238_v43, %v113_v40  ;;  %v240_v45 = vpop.f32.mrb[2].mxu0 }
 0x152   :  { %v241_v46 = vadd.f32 %v240_v45, %v109_v39  ;;  %v242_v47 = vpop.f32.mrb[3].mxu0  ;;  %v245_v49 = vmax.f32 %v237_v42, 0.0 }
 0x153   :  { %v243_v48 = vadd.f32 %v242_v47, %v113_v40  ;;  %v246_v51 = vmax.f32 %v239_v44, 0.0 }
 0x154   :  { %v247_v50 = vmax.f32 %v241_v46, 0.0 }
 0x155   :  { %v248_v52 = vmax.f32 %v243_v48, 0.0 }
 0x156   :  { %v249_v53 = vpack.c.bf16 %v247_v50, %v245_v49 }
 0x157   :  { %v250_v54 = vpack.c.bf16 %v248_v52, %v246_v51 }
 0x159   :  { %418 = vmatprep.mubr.bf16.mxu1 %v250_v54 }
 0x15a   :  { %419 = vmatmul.mubr.bf16.vlgmr.msra.gmra.mrb[0].mxu1 %v249_v53 }
 0x22d   :  { %v498_v55 = vpop.f32.mrb[0].mxu1 }
 0x22e   :  { %v499_v57 = vpop.f32.mrb[1].mxu1 }
 0x22f   :  { %v500_v58 = vadd.f32 %v499_v57, %v498_v55  ;;  %v501_v59 = vpop.f32.mrb[2].mxu1 }
 0x230   :  { %v502_v60 = vpop.f32.mrb[3].mxu1 }
 0x231   :  { %v421_v61 = vadd.f32 %v500_v58, %v465_v56  ;;  %v503_v62 = vadd.f32 %v502_v60, %v501_v59 }
 0x233   :  { %427 = vst [vmem:[#allocation11] sm:$0xff] %v421_v61  ;;  %v424_v63 = vadd.f32 %v503_v62, %v465_v56 }
 0x235   :  { %428 = vst [vmem:[#allocation11 + $0x8] sm:$0xff] %v424_v63 }
 0x236   :  { %677 = shalt.err (!%p674_p2)
}
 0x237   :  { %s678_s11 = scalar_lea.hbm %s820_s5, 256 }
 0x238   :  { %p679_p3 = scmp.ne.s32.totalorder %s820_s5, %s678_s11  ;;  %p682_p4 = scmp.lt.u32.totalorder %s678_s11, %s820_s5 }
 0x23a   :  { %p684_p5 = pnand %p682_p4, %p679_p3 }
 0x23c   :  { %687 = shalt.err (!%p684_p5)
}
 0x23d   :  { %440 = dma.vmem_to_hbm [thread:$0]  %s435_s3, 256, %s820_s5, [#allocation4], %s697_s28, %s697_s28, %s698_s29  }
 0x23e   :  { %694 = dma.done.wait [#allocation4], 256  }
 0x23f   :  { %695 = vsyncadd [#allocation4], 4294967040 }
 0x240   :  { %444 = vsyncpa [#allocation3], 1 }
 0x241   :  { %445 = vsyncpa [#allocation6], 1 }
 0x242   :  { %446 = vsyncpa [#allocation9], 1 }
 0x243   :  { %447 = vsyncpa [#allocation4], 1 }

</bundles_post_ra>
